<compile_context>
chip_gen: v6e
topology: v6e:2x2x1
jax: 0.10.0
libtpu: 0.0.40
codegen_flags: <defaults>
</compile_context>

<pallas_src>
import math
import jax
import jax.numpy as jnp
from jax import lax
from jax.experimental import pallas as pl
from jax.experimental.pallas import tpu as pltpu


def _make_kernel(*, eps, tq, heads, dim_head, has_bias):
    def kernel(x_ref, g_ref, beta_ref, wq_ref, wk_ref, wv_ref, wo_ref, *rest):
        if has_bias:
            bias_ref, o_ref, xn_s, kT_s, v_s, qblk_s, o_acc = rest
        else:
            bias_ref = None
            o_ref, xn_s, kT_s, v_s, qblk_s, o_acc = rest

        qi = pl.program_id(1)
        h = pl.program_id(2)

        # ---- once per batch: LayerNorm + K/V projections for ALL heads ----
        @pl.when((qi == 0) & (h == 0))
        def _():
            x = x_ref[0]                                       # (N, D) f32
            mean = jnp.mean(x, axis=-1, keepdims=True)
            xc = x - mean
            var = jnp.mean(xc * xc, axis=-1, keepdims=True)
            xn = ((xc * lax.rsqrt(var + eps)) * g_ref[0] + beta_ref[0]
                  ).astype(jnp.bfloat16)
            xn_s[...] = xn                                     # bf16 MXU operand

            # Wide (inner >= heads*d lanes) projections -> good MXU fill even
            # for dim_head=64 on the 256-wide MXUs.  K is produced already
            # transposed (inner, N): lane-dense along the sequence axis.
            kT_all = lax.dot_general(
                wk_ref[...], xn, (((1,), (1,)), ((), ())),
                preferred_element_type=jnp.float32).astype(jnp.bfloat16)   # (inner, N)
            v_all = jnp.dot(xn, wv_ref[...],
                            preferred_element_type=jnp.float32
                            ).astype(jnp.bfloat16)                         # (N, inner)
            for hh in range(heads):                            # static split per head
                lo = hh * dim_head
                kT_s[hh] = kT_all[lo:lo + dim_head, :]
                v_s[hh] = v_all[:, lo:lo + dim_head]

        # ---- once per (batch, q-block): Q projection for ALL heads ----
        @pl.when(h == 0)
        def _():
            row0 = pl.multiple_of(qi * tq, tq)
            xn_q = xn_s[pl.ds(row0, tq), :]                    # (tq, D) bf16
            q_all = jnp.dot(xn_q, wq_ref[...],                 # scale pre-folded
                            preferred_element_type=jnp.float32
                            ).astype(jnp.bfloat16)             # (tq, inner)
            for hh in range(heads):
                lo = hh * dim_head
                qblk_s[hh] = q_all[:, lo:lo + dim_head]

        # ---- per (q-block, head) attention ----
        qh = qblk_s[h]                                         # (tq, d)  bf16
        kT = kT_s[h]                                           # (d, N)   bf16
        vh = v_s[h]                                            # (N, d)   bf16

        sim = jnp.dot(qh, kT, preferred_element_type=jnp.float32)   # (tq, N) f32
        if has_bias:
            sim = sim + bias_ref[0].astype(jnp.float32)

        # numerically-stable softmax; normalization deferred past attn @ V
        m = jnp.max(sim, axis=-1, keepdims=True)
        e = jnp.exp(sim - m)
        denom = jnp.sum(e, axis=-1, keepdims=True)
        oh = jnp.dot(e.astype(jnp.bfloat16), vh,
                     preferred_element_type=jnp.float32)             # (tq, d)
        oh = oh * pl.reciprocal(denom, approx=True)                  # (tq, d) scale

        # fused head-merge + output projection: sum_h O_h @ Wout_h
        contrib = jnp.dot(oh.astype(jnp.bfloat16), wo_ref[h],
                          preferred_element_type=jnp.float32)        # (tq, D)

        @pl.when(h == 0)
        def _():
            o_acc[...] = contrib                   # init by assignment (no zero fill)

        @pl.when(h > 0)
        def _():
            o_acc[...] += contrib

        @pl.when(h == pl.num_programs(2) - 1)
        def _():
            o_ref[0] = o_acc[...].astype(o_ref.dtype)

    return kernel


def _pick_tq(N):
    # Largest divisor of N from a bounded chain; keeps the live (tq, N) score
    # matrix / bias tile bounded (prefer 128 for long sequences: v7x VMEM).
    candidates = (128, 256, 64, 32, 16, 8) if N > 2048 else (256, 128, 64, 32, 16, 8)
    for cand in candidates:
        if N % cand == 0:
            return cand
    return N


def attention_old_pallas(x, params, rel_pos_bias=None, *, heads, dim_head, eps=1e-5):
    """x: (B, N, D) float32.  rel_pos_bias: None or (heads, N, N)."""
    B, N, D = x.shape
    inner = heads * dim_head
    scale = dim_head ** (-0.5)

    # --- one-time host-side weight prep ---
    wq = params["wq"]                                   # (inner, D)
    wkv = params["wkv"]                                 # (2*inner, D)
    wout = params["wout"]                               # (D, inner)
    wk, wv = wkv[:inner], wkv[inner:]

    wq_t = (jnp.transpose(wq) * scale).astype(jnp.bfloat16)    # (D, inner), scale folded
    wk_m = wk.astype(jnp.bfloat16)                              # (inner, D)  (K^T producer)
    wv_t = jnp.transpose(wv).astype(jnp.bfloat16)               # (D, inner)
    wout_h = jnp.transpose(wout).reshape(heads, dim_head, D).astype(jnp.bfloat16)

    ln_g = params["ln_g"].reshape(1, D).astype(jnp.float32)
    ln_b = params["ln_b"].reshape(1, D).astype(jnp.float32)

    tq = _pick_tq(N)
    grid = (B, N // tq, heads)
    has_bias = rel_pos_bias is not None

    in_specs = [
        pl.BlockSpec((1, N, D), lambda b, qi, h: (b, 0, 0)),             # x (f32)
        pl.BlockSpec((1, D), lambda b, qi, h: (0, 0)),                   # ln gamma
        pl.BlockSpec((1, D), lambda b, qi, h: (0, 0)),                   # ln beta
        pl.BlockSpec((D, inner), lambda b, qi, h: (0, 0)),               # WqT (resident)
        pl.BlockSpec((inner, D), lambda b, qi, h: (0, 0)),               # Wk  (resident)
        pl.BlockSpec((D, inner), lambda b, qi, h: (0, 0)),               # WvT (resident)
        pl.BlockSpec((heads, dim_head, D), lambda b, qi, h: (0, 0, 0)),  # Wout (resident)
    ]
    args = [x.astype(jnp.float32), ln_g, ln_b, wq_t, wk_m, wv_t, wout_h]
    if has_bias:
        # One head's (tq, N) bf16 tile per step -- halves the dominant HBM stream.
        in_specs.append(pl.BlockSpec((1, tq, N), lambda b, qi, h: (h, qi, 0)))
        args.append(rel_pos_bias.astype(jnp.bfloat16))

    # Rough VMEM budget (double-buffered inputs + scratch), clamped to stay
    # within the default/physical limits on every generation (v7x: 64 MiB).
    # NOTE: for very long sequences on v7x, pass x as bf16 to halve its buffer.
    est = (
        2 * N * D * 4                        # x block (double buffered)
        + 2 * 4 * D * inner * 2              # resident weights (conservative x2)
        + (2 * tq * N * 2 if has_bias else 0)
        + 2 * tq * D * 4                     # output block
        + N * D * 2                          # xn_s
        + 2 * N * inner * 2                  # kT_s + v_s
        + heads * tq * dim_head * 2          # qblk_s
        + tq * D * 4                         # o_acc
    )
    vmem_limit = int(min(max(2 * est, 32 * 1024 * 1024), 64 * 1024 * 1024))

    kernel = _make_kernel(eps=eps, tq=tq, heads=heads, dim_head=dim_head,
                          has_bias=has_bias)

    return pl.pallas_call(
        kernel,
        out_shape=jax.ShapeDtypeStruct((B, N, D), x.dtype),
        grid_spec=pltpu.PrefetchScalarGridSpec(
            num_scalar_prefetch=0,
            grid=grid,
            in_specs=in_specs,
            out_specs=pl.BlockSpec((1, tq, D), lambda b, qi, h: (b, qi, 0)),
            scratch_shapes=[
                pltpu.VMEM((N, D), jnp.bfloat16),                 # xn_s  (per batch)
                pltpu.VMEM((heads, dim_head, N), jnp.bfloat16),   # K^T cache (per batch)
                pltpu.VMEM((heads, N, dim_head), jnp.bfloat16),   # V cache   (per batch)
                pltpu.VMEM((heads, tq, dim_head), jnp.bfloat16),  # Q block   (per q-block)
                pltpu.VMEM((tq, D), jnp.float32),                 # output accumulator
            ],
        ),
        # qi/h must be "arbitrary": per-batch caches are only valid if each core
        # visits (qi==0, h==0) first for every batch it owns (megacore-safe).
        compiler_params=pltpu.CompilerParams(
            dimension_semantics=("parallel", "arbitrary", "arbitrary"),
            vmem_limit_bytes=vmem_limit),
    )(*args)


def attention_old_reference(x, params, rel_pos_bias=None, *, heads, dim_head, eps=1e-5):
    """Pure-JAX (f32) reference mirroring the PyTorch forward exactly."""
    B, N, D = x.shape
    inner = heads * dim_head
    mean = jnp.mean(x, axis=-1, keepdims=True)
    var = jnp.mean((x - mean) ** 2, axis=-1, keepdims=True)
    xn = (x - mean) / jnp.sqrt(var + eps) * params["ln_g"] + params["ln_b"]

    q = xn @ params["wq"].T
    kv = xn @ params["wkv"].T
    k, v = kv[..., :inner], kv[..., inner:]

    def to_heads(t):  # 'b n (h d) -> b h n d'
        return t.reshape(B, N, heads, dim_head).transpose(0, 2, 1, 3)

    q, k, v = map(to_heads, (q, k, v))
    q = q * dim_head ** (-0.5)
    sim = jnp.einsum("bhid,bhjd->bhij", q, k)
    if rel_pos_bias is not None:
        sim = sim + rel_pos_bias
    attn = jax.nn.softmax(sim, axis=-1)
    out = jnp.einsum("bhij,bhjd->bhid", attn, v)
    out = out.transpose(0, 2, 1, 3).reshape(B, N, inner)
    return out @ params["wout"].T


if __name__ == "__main__":
    dim, heads, dim_head = 32, 4, 16
    B, N = 2, 8
    inner = heads * dim_head

    key = jax.random.PRNGKey(0)
    kx, kb, kq, kkv, ko = jax.random.split(key, 5)
    x = jax.random.normal(kx, (B, N, dim), jnp.float32)
    rel_pos_bias = jax.random.normal(kb, (heads, N, N), jnp.float32)

    bound_in = 1.0 / math.sqrt(dim)
    bound_out = 1.0 / math.sqrt(inner)
    params = {
        "wq": jax.random.uniform(kq, (inner, dim), jnp.float32, -bound_in, bound_in),
        "wkv": jax.random.uniform(kkv, (2 * inner, dim), jnp.float32, -bound_in, bound_in),
        # NOTE: the PyTorch module zero-inits to_out.weight; a random weight is
        # used here so the forward-pass check is non-trivial (init is irrelevant
        # to the forward semantics being tested).
        "wout": jax.random.uniform(ko, (dim, inner), jnp.float32, -bound_out, bound_out),
        "ln_g": jnp.ones((dim,), jnp.float32),
        "ln_b": jnp.zeros((dim,), jnp.float32),
    }

    # bf16 MXU operands / bf16 bias (f32 accumulation + softmax stats) -> loosened tol.
    TOL = dict(atol=5e-2, rtol=5e-2)

    out_b = jax.block_until_ready(
        attention_old_pallas(x, params, rel_pos_bias, heads=heads, dim_head=dim_head))
    ref_b = attention_old_reference(x, params, rel_pos_bias, heads=heads, dim_head=dim_head)
    assert out_b.shape == (B, N, dim)
    assert jnp.allclose(out_b, ref_b, **TOL), (
        f"bias path mismatch, max abs err={float(jnp.max(jnp.abs(out_b - ref_b)))}")

    out_nb = jax.block_until_ready(
        attention_old_pallas(x, params, None, heads=heads, dim_head=dim_head))
    ref_nb = attention_old_reference(x, params, None, heads=heads, dim_head=dim_head)
    assert jnp.allclose(out_nb, ref_nb, **TOL), (
        f"no-bias path mismatch, max abs err={float(jnp.max(jnp.abs(out_nb - ref_nb)))}")

    print("KERNEL_OK")
</pallas_src>

<mosaic_0001>
module attributes {stable_mosaic.version = 11 : i64} {
  func.func @kernel(%arg0: i32, %arg1: i32, %arg2: i32, %arg3: memref<1x8x32xf32, #tpu.memory_space<vmem>>, %arg4: memref<1x32xf32, #tpu.memory_space<vmem>>, %arg5: memref<1x32xf32, #tpu.memory_space<vmem>>, %arg6: memref<32x64xbf16, #tpu.memory_space<vmem>>, %arg7: memref<64x32xbf16, #tpu.memory_space<vmem>>, %arg8: memref<32x64xbf16, #tpu.memory_space<vmem>>, %arg9: memref<4x16x32xbf16, #tpu.memory_space<vmem>>, %arg10: memref<1x8x8xbf16, #tpu.memory_space<vmem>>, %arg11: memref<1x8x32xf32, #tpu.memory_space<vmem>>, %arg12: memref<8x32xbf16, #tpu.memory_space<vmem>>, %arg13: memref<4x16x8xbf16, #tpu.memory_space<vmem>>, %arg14: memref<4x8x16xbf16, #tpu.memory_space<vmem>>, %arg15: memref<4x8x16xbf16, #tpu.memory_space<vmem>>, %arg16: memref<8x32xf32, #tpu.memory_space<vmem>>) attributes {dimension_semantics = [#tpu.dimension_semantics<parallel>, #tpu.dimension_semantics<arbitrary>, #tpu.dimension_semantics<arbitrary>], iteration_bounds = array<i64: 2, 1, 4>, scalar_prefetch = 0 : i64, scratch_operands = 5 : i64, tpu.core_type = #tpu.core_type<tc>, window_params = [{transform_indices = @transform_0, window_bounds = array<i64: 1, 8, 32>}, {pipeline_mode = #tpu.pipeline_mode<synchronous>, transform_indices = @transform_1, window_bounds = array<i64: 1, 32>}, {pipeline_mode = #tpu.pipeline_mode<synchronous>, transform_indices = @transform_2, window_bounds = array<i64: 1, 32>}, {pipeline_mode = #tpu.pipeline_mode<synchronous>, transform_indices = @transform_3, window_bounds = array<i64: 32, 64>}, {pipeline_mode = #tpu.pipeline_mode<synchronous>, transform_indices = @transform_4, window_bounds = array<i64: 64, 32>}, {pipeline_mode = #tpu.pipeline_mode<synchronous>, transform_indices = @transform_5, window_bounds = array<i64: 32, 64>}, {pipeline_mode = #tpu.pipeline_mode<synchronous>, transform_indices = @transform_6, window_bounds = array<i64: 4, 16, 32>}, {transform_indices = @transform_7, window_bounds = array<i64: 1, 8, 8>}, {transform_indices = @transform_8, window_bounds = array<i64: 1, 8, 32>}]} {
    %c0_i32 = arith.constant 0 : i32
    %0 = arith.cmpi eq, %arg1, %c0_i32 : i32
    %c0_i32_0 = arith.constant 0 : i32
    %1 = arith.cmpi eq, %arg2, %c0_i32_0 : i32
    %2 = arith.andi %0, %1 : i1
    %3 = arith.extui %2 : i1 to i32
    %c0_i32_1 = arith.constant 0 : i32
    %4 = arith.cmpi ne, %3, %c0_i32_1 : i32
    scf.if %4 {
      %c0_23 = arith.constant 0 : index
      %c0_24 = arith.constant 0 : index
      %c0_25 = arith.constant 0 : index
      %48 = vector.load %arg3[%c0_23, %c0_24, %c0_25] : memref<1x8x32xf32, #tpu.memory_space<vmem>>, vector<1x8x32xf32>
      %49 = vector.shape_cast %48 : vector<1x8x32xf32> to vector<8x32xf32>
      %cst_26 = arith.constant dense<0.000000e+00> : vector<8xf32>
      %50 = vector.multi_reduction <add>, %49, %cst_26 [1] : vector<8x32xf32> to vector<8xf32>
      %51 = vector.shape_cast %50 : vector<8xf32> to vector<8x1xf32>
      %cst_27 = arith.constant 3.200000e+01 : f32
      %52 = vector.broadcast %cst_27 : f32 to vector<8x1xf32>
      %53 = arith.divf %51, %52 : vector<8x1xf32>
      %54 = vector.broadcast %53 : vector<8x1xf32> to vector<8x32xf32>
      %55 = arith.subf %49, %54 : vector<8x32xf32>
      %56 = arith.mulf %55, %55 : vector<8x32xf32>
      %cst_28 = arith.constant dense<0.000000e+00> : vector<8xf32>
      %57 = vector.multi_reduction <add>, %56, %cst_28 [1] : vector<8x32xf32> to vector<8xf32>
      %58 = vector.shape_cast %57 : vector<8xf32> to vector<8x1xf32>
      %cst_29 = arith.constant 3.200000e+01 : f32
      %59 = vector.broadcast %cst_29 : f32 to vector<8x1xf32>
      %60 = arith.divf %58, %59 : vector<8x1xf32>
      %cst_30 = arith.constant 9.99999974E-6 : f32
      %61 = vector.broadcast %cst_30 : f32 to vector<8x1xf32>
      %62 = arith.addf %60, %61 : vector<8x1xf32>
      %63 = math.rsqrt %62 : vector<8x1xf32>
      %64 = vector.broadcast %63 : vector<8x1xf32> to vector<8x32xf32>
      %65 = arith.mulf %55, %64 : vector<8x32xf32>
      %c0_31 = arith.constant 0 : index
      %c0_32 = arith.constant 0 : index
      %66 = vector.load %arg4[%c0_31, %c0_32] : memref<1x32xf32, #tpu.memory_space<vmem>>, vector<1x32xf32>
      %67 = vector.shape_cast %66 : vector<1x32xf32> to vector<32xf32>
      %68 = vector.shape_cast %67 : vector<32xf32> to vector<1x32xf32>
      %69 = vector.broadcast %68 : vector<1x32xf32> to vector<8x32xf32>
      %70 = arith.mulf %65, %69 : vector<8x32xf32>
      %c0_33 = arith.constant 0 : index
      %c0_34 = arith.constant 0 : index
      %71 = vector.load %arg5[%c0_33, %c0_34] : memref<1x32xf32, #tpu.memory_space<vmem>>, vector<1x32xf32>
      %72 = vector.shape_cast %71 : vector<1x32xf32> to vector<32xf32>
      %73 = vector.shape_cast %72 : vector<32xf32> to vector<1x32xf32>
      %74 = vector.broadcast %73 : vector<1x32xf32> to vector<8x32xf32>
      %75 = arith.addf %70, %74 : vector<8x32xf32>
      %76 = arith.truncf %75 : vector<8x32xf32> to vector<8x32xbf16>
      %c0_35 = arith.constant 0 : index
      %c0_36 = arith.constant 0 : index
      %77 = vector.load %arg12[%c0_35, %c0_36] : memref<8x32xbf16, #tpu.memory_space<vmem>>, vector<8x32xbf16>
      tpu.vector_store %arg12[%c0_35, %c0_36], %76 {strides = array<i32>} : memref<8x32xbf16, #tpu.memory_space<vmem>>, vector<8x32xbf16>,
      %c0_37 = arith.constant 0 : index
      %c0_38 = arith.constant 0 : index
      %78 = vector.load %arg7[%c0_37, %c0_38] : memref<64x32xbf16, #tpu.memory_space<vmem>>, vector<64x32xbf16>
      %cst_39 = arith.constant dense<0.000000e+00> : vector<64x8xf32>
      %79 = tpu.matmul %78, %76, %cst_39 {dimension_numbers = #tpu.dot_dimension_numbers<[1], [1], [0], [0], [0, 0, 1, 0], [], []>} : vector<64x32xbf16>, vector<8x32xbf16>, vector<64x8xf32> -> vector<64x8xf32>
      %80 = arith.truncf %79 : vector<64x8xf32> to vector<64x8xbf16>
      %c0_40 = arith.constant 0 : index
      %c0_41 = arith.constant 0 : index
      %81 = vector.load %arg8[%c0_40, %c0_41] : memref<32x64xbf16, #tpu.memory_space<vmem>>, vector<32x64xbf16>
      %cst_42 = arith.constant dense<0.000000e+00> : vector<8x64xf32>
      %82 = tpu.matmul %76, %81, %cst_42 {dimension_numbers = #tpu.dot_dimension_numbers<[1], [0], [0], [1], [0, 0, 1, 1], [], []>} : vector<8x32xbf16>, vector<32x64xbf16>, vector<8x64xf32> -> vector<8x64xf32>
      %83 = arith.truncf %82 : vector<8x64xf32> to vector<8x64xbf16>
      %84 = vector.extract_strided_slice %80 {offsets = [0, 0], sizes = [16, 8], strides = [1, 1]} : vector<64x8xbf16> to vector<16x8xbf16>
      %c0_43 = arith.constant 0 : index
      %c0_44 = arith.constant 0 : index
      %c0_45 = arith.constant 0 : index
      %85 = vector.load %arg13[%c0_43, %c0_44, %c0_45] : memref<4x16x8xbf16, #tpu.memory_space<vmem>>, vector<1x16x8xbf16>
      %86 = vector.shape_cast %85 : vector<1x16x8xbf16> to vector<16x8xbf16>
      %87 = vector.shape_cast %84 : vector<16x8xbf16> to vector<1x16x8xbf16>
      tpu.vector_store %arg13[%c0_43, %c0_44, %c0_45], %87 {strides = array<i32>} : memref<4x16x8xbf16, #tpu.memory_space<vmem>>, vector<1x16x8xbf16>,
      %88 = vector.extract_strided_slice %83 {offsets = [0, 0], sizes = [8, 16], strides = [1, 1]} : vector<8x64xbf16> to vector<8x16xbf16>
      %c0_46 = arith.constant 0 : index
      %c0_47 = arith.constant 0 : index
      %c0_48 = arith.constant 0 : index
      %89 = vector.load %arg14[%c0_46, %c0_47, %c0_48] : memref<4x8x16xbf16, #tpu.memory_space<vmem>>, vector<1x8x16xbf16>
      %90 = vector.shape_cast %89 : vector<1x8x16xbf16> to vector<8x16xbf16>
      %91 = vector.shape_cast %88 : vector<8x16xbf16> to vector<1x8x16xbf16>
      tpu.vector_store %arg14[%c0_46, %c0_47, %c0_48], %91 {strides = array<i32>} : memref<4x8x16xbf16, #tpu.memory_space<vmem>>, vector<1x8x16xbf16>,
      %92 = vector.extract_strided_slice %80 {offsets = [16, 0], sizes = [16, 8], strides = [1, 1]} : vector<64x8xbf16> to vector<16x8xbf16>
      %c1 = arith.constant 1 : index
      %c0_49 = arith.constant 0 : index
      %c0_50 = arith.constant 0 : index
      %93 = vector.load %arg13[%c1, %c0_49, %c0_50] : memref<4x16x8xbf16, #tpu.memory_space<vmem>>, vector<1x16x8xbf16>
      %94 = vector.shape_cast %93 : vector<1x16x8xbf16> to vector<16x8xbf16>
      %95 = vector.shape_cast %92 : vector<16x8xbf16> to vector<1x16x8xbf16>
      tpu.vector_store %arg13[%c1, %c0_49, %c0_50], %95 {strides = array<i32>} : memref<4x16x8xbf16, #tpu.memory_space<vmem>>, vector<1x16x8xbf16>,
      %96 = vector.extract_strided_slice %83 {offsets = [0, 16], sizes = [8, 16], strides = [1, 1]} : vector<8x64xbf16> to vector<8x16xbf16>
      %c1_51 = arith.constant 1 : index
      %c0_52 = arith.constant 0 : index
      %c0_53 = arith.constant 0 : index
      %97 = vector.load %arg14[%c1_51, %c0_52, %c0_53] : memref<4x8x16xbf16, #tpu.memory_space<vmem>>, vector<1x8x16xbf16>
      %98 = vector.shape_cast %97 : vector<1x8x16xbf16> to vector<8x16xbf16>
      %99 = vector.shape_cast %96 : vector<8x16xbf16> to vector<1x8x16xbf16>
      tpu.vector_store %arg14[%c1_51, %c0_52, %c0_53], %99 {strides = array<i32>} : memref<4x8x16xbf16, #tpu.memory_space<vmem>>, vector<1x8x16xbf16>,
      %100 = vector.extract_strided_slice %80 {offsets = [32, 0], sizes = [16, 8], strides = [1, 1]} : vector<64x8xbf16> to vector<16x8xbf16>
      %c2 = arith.constant 2 : index
      %c0_54 = arith.constant 0 : index
      %c0_55 = arith.constant 0 : index
      %101 = vector.load %arg13[%c2, %c0_54, %c0_55] : memref<4x16x8xbf16, #tpu.memory_space<vmem>>, vector<1x16x8xbf16>
      %102 = vector.shape_cast %101 : vector<1x16x8xbf16> to vector<16x8xbf16>
      %103 = vector.shape_cast %100 : vector<16x8xbf16> to vector<1x16x8xbf16>
      tpu.vector_store %arg13[%c2, %c0_54, %c0_55], %103 {strides = array<i32>} : memref<4x16x8xbf16, #tpu.memory_space<vmem>>, vector<1x16x8xbf16>,
      %104 = vector.extract_strided_slice %83 {offsets = [0, 32], sizes = [8, 16], strides = [1, 1]} : vector<8x64xbf16> to vector<8x16xbf16>
      %c2_56 = arith.constant 2 : index
      %c0_57 = arith.constant 0 : index
      %c0_58 = arith.constant 0 : index
      %105 = vector.load %arg14[%c2_56, %c0_57, %c0_58] : memref<4x8x16xbf16, #tpu.memory_space<vmem>>, vector<1x8x16xbf16>
      %106 = vector.shape_cast %105 : vector<1x8x16xbf16> to vector<8x16xbf16>
      %107 = vector.shape_cast %104 : vector<8x16xbf16> to vector<1x8x16xbf16>
      tpu.vector_store %arg14[%c2_56, %c0_57, %c0_58], %107 {strides = array<i32>} : memref<4x8x16xbf16, #tpu.memory_space<vmem>>, vector<1x8x16xbf16>,
      %108 = vector.extract_strided_slice %80 {offsets = [48, 0], sizes = [16, 8], strides = [1, 1]} : vector<64x8xbf16> to vector<16x8xbf16>
      %c3 = arith.constant 3 : index
      %c0_59 = arith.constant 0 : index
      %c0_60 = arith.constant 0 : index
      %109 = vector.load %arg13[%c3, %c0_59, %c0_60] : memref<4x16x8xbf16, #tpu.memory_space<vmem>>, vector<1x16x8xbf16>
      %110 = vector.shape_cast %109 : vector<1x16x8xbf16> to vector<16x8xbf16>
      %111 = vector.shape_cast %108 : vector<16x8xbf16> to vector<1x16x8xbf16>
      tpu.vector_store %arg13[%c3, %c0_59, %c0_60], %111 {strides = array<i32>} : memref<4x16x8xbf16, #tpu.memory_space<vmem>>, vector<1x16x8xbf16>,
      %112 = vector.extract_strided_slice %83 {offsets = [0, 48], sizes = [8, 16], strides = [1, 1]} : vector<8x64xbf16> to vector<8x16xbf16>
      %c3_61 = arith.constant 3 : index
      %c0_62 = arith.constant 0 : index
      %c0_63 = arith.constant 0 : index
      %113 = vector.load %arg14[%c3_61, %c0_62, %c0_63] : memref<4x8x16xbf16, #tpu.memory_space<vmem>>, vector<1x8x16xbf16>
      %114 = vector.shape_cast %113 : vector<1x8x16xbf16> to vector<8x16xbf16>
      %115 = vector.shape_cast %112 : vector<8x16xbf16> to vector<1x8x16xbf16>
      tpu.vector_store %arg14[%c3_61, %c0_62, %c0_63], %115 {strides = array<i32>} : memref<4x8x16xbf16, #tpu.memory_space<vmem>>, vector<1x8x16xbf16>,
    } else {
    }
    %c0_i32_2 = arith.constant 0 : i32
    %5 = arith.cmpi eq, %arg2, %c0_i32_2 : i32
    %6 = arith.extui %5 : i1 to i32
    %c0_i32_3 = arith.constant 0 : i32
    %7 = arith.cmpi ne, %6, %c0_i32_3 : i32
    scf.if %7 {
      %c8_i32 = arith.constant 8 : i32
      %48 = arith.muli %arg1, %c8_i32 : i32
      %49 = tpu.assume_multiple %48, 8 : i32
      %50 = arith.index_cast %49 : i32 to index
      %c0_23 = arith.constant 0 : index
      %51 = vector.load %arg12[%50, %c0_23] : memref<8x32xbf16, #tpu.memory_space<vmem>>, vector<8x32xbf16>
      %c0_24 = arith.constant 0 : index
      %c0_25 = arith.constant 0 : index
      %52 = vector.load %arg6[%c0_24, %c0_25] : memref<32x64xbf16, #tpu.memory_space<vmem>>, vector<32x64xbf16>
      %cst_26 = arith.constant dense<0.000000e+00> : vector<8x64xf32>
      %53 = tpu.matmul %51, %52, %cst_26 {dimension_numbers = #tpu.dot_dimension_numbers<[1], [0], [0], [1], [0, 0, 1, 1], [], []>} : vector<8x32xbf16>, vector<32x64xbf16>, vector<8x64xf32> -> vector<8x64xf32>
      %54 = arith.truncf %53 : vector<8x64xf32> to vector<8x64xbf16>
      %55 = vector.extract_strided_slice %54 {offsets = [0, 0], sizes = [8, 16], strides = [1, 1]} : vector<8x64xbf16> to vector<8x16xbf16>
      %c0_27 = arith.constant 0 : index
      %c0_28 = arith.constant 0 : index
      %c0_29 = arith.constant 0 : index
      %56 = vector.load %arg15[%c0_27, %c0_28, %c0_29] : memref<4x8x16xbf16, #tpu.memory_space<vmem>>, vector<1x8x16xbf16>
      %57 = vector.shape_cast %56 : vector<1x8x16xbf16> to vector<8x16xbf16>
      %58 = vector.shape_cast %55 : vector<8x16xbf16> to vector<1x8x16xbf16>
      tpu.vector_store %arg15[%c0_27, %c0_28, %c0_29], %58 {strides = array<i32>} : memref<4x8x16xbf16, #tpu.memory_space<vmem>>, vector<1x8x16xbf16>,
      %59 = vector.extract_strided_slice %54 {offsets = [0, 16], sizes = [8, 16], strides = [1, 1]} : vector<8x64xbf16> to vector<8x16xbf16>
      %c1 = arith.constant 1 : index
      %c0_30 = arith.constant 0 : index
      %c0_31 = arith.constant 0 : index
      %60 = vector.load %arg15[%c1, %c0_30, %c0_31] : memref<4x8x16xbf16, #tpu.memory_space<vmem>>, vector<1x8x16xbf16>
      %61 = vector.shape_cast %60 : vector<1x8x16xbf16> to vector<8x16xbf16>
      %62 = vector.shape_cast %59 : vector<8x16xbf16> to vector<1x8x16xbf16>
      tpu.vector_store %arg15[%c1, %c0_30, %c0_31], %62 {strides = array<i32>} : memref<4x8x16xbf16, #tpu.memory_space<vmem>>, vector<1x8x16xbf16>,
      %63 = vector.extract_strided_slice %54 {offsets = [0, 32], sizes = [8, 16], strides = [1, 1]} : vector<8x64xbf16> to vector<8x16xbf16>
      %c2 = arith.constant 2 : index
      %c0_32 = arith.constant 0 : index
      %c0_33 = arith.constant 0 : index
      %64 = vector.load %arg15[%c2, %c0_32, %c0_33] : memref<4x8x16xbf16, #tpu.memory_space<vmem>>, vector<1x8x16xbf16>
      %65 = vector.shape_cast %64 : vector<1x8x16xbf16> to vector<8x16xbf16>
      %66 = vector.shape_cast %63 : vector<8x16xbf16> to vector<1x8x16xbf16>
      tpu.vector_store %arg15[%c2, %c0_32, %c0_33], %66 {strides = array<i32>} : memref<4x8x16xbf16, #tpu.memory_space<vmem>>, vector<1x8x16xbf16>,
      %67 = vector.extract_strided_slice %54 {offsets = [0, 48], sizes = [8, 16], strides = [1, 1]} : vector<8x64xbf16> to vector<8x16xbf16>
      %c3 = arith.constant 3 : index
      %c0_34 = arith.constant 0 : index
      %c0_35 = arith.constant 0 : index
      %68 = vector.load %arg15[%c3, %c0_34, %c0_35] : memref<4x8x16xbf16, #tpu.memory_space<vmem>>, vector<1x8x16xbf16>
      %69 = vector.shape_cast %68 : vector<1x8x16xbf16> to vector<8x16xbf16>
      %70 = vector.shape_cast %67 : vector<8x16xbf16> to vector<1x8x16xbf16>
      tpu.vector_store %arg15[%c3, %c0_34, %c0_35], %70 {strides = array<i32>} : memref<4x8x16xbf16, #tpu.memory_space<vmem>>, vector<1x8x16xbf16>,
    } else {
    }
    %8 = arith.index_cast %arg2 : i32 to index
    %c0 = arith.constant 0 : index
    %c0_4 = arith.constant 0 : index
    %9 = vector.load %arg15[%8, %c0, %c0_4] : memref<4x8x16xbf16, #tpu.memory_space<vmem>>, vector<1x8x16xbf16>
    %10 = vector.shape_cast %9 : vector<1x8x16xbf16> to vector<8x16xbf16>
    %11 = arith.index_cast %arg2 : i32 to index
    %c0_5 = arith.constant 0 : index
    %c0_6 = arith.constant 0 : index
    %12 = vector.load %arg13[%11, %c0_5, %c0_6] : memref<4x16x8xbf16, #tpu.memory_space<vmem>>, vector<1x16x8xbf16>
    %13 = vector.shape_cast %12 : vector<1x16x8xbf16> to vector<16x8xbf16>
    %14 = arith.index_cast %arg2 : i32 to index
    %c0_7 = arith.constant 0 : index
    %c0_8 = arith.constant 0 : index
    %15 = vector.load %arg14[%14, %c0_7, %c0_8] : memref<4x8x16xbf16, #tpu.memory_space<vmem>>, vector<1x8x16xbf16>
    %16 = vector.shape_cast %15 : vector<1x8x16xbf16> to vector<8x16xbf16>
    %cst = arith.constant dense<0.000000e+00> : vector<8x8xf32>
    %17 = tpu.matmul %10, %13, %cst {dimension_numbers = #tpu.dot_dimension_numbers<[1], [0], [0], [1], [0, 0, 1, 1], [], []>} : vector<8x16xbf16>, vector<16x8xbf16>, vector<8x8xf32> -> vector<8x8xf32>
    %c0_9 = arith.constant 0 : index
    %c0_10 = arith.constant 0 : index
    %c0_11 = arith.constant 0 : index
    %18 = vector.load %arg10[%c0_9, %c0_10, %c0_11] : memref<1x8x8xbf16, #tpu.memory_space<vmem>>, vector<1x8x8xbf16>
    %19 = vector.shape_cast %18 : vector<1x8x8xbf16> to vector<8x8xbf16>
    %20 = arith.extf %19 : vector<8x8xbf16> to vector<8x8xf32>
    %21 = arith.addf %17, %20 : vector<8x8xf32>
    %cst_12 = arith.constant dense<0xFF800000> : vector<8xf32>
    %22 = vector.multi_reduction <maximumf>, %21, %cst_12 [1] : vector<8x8xf32> to vector<8xf32>
    %23 = vector.shape_cast %22 : vector<8xf32> to vector<8x1xf32>
    %24 = vector.broadcast %23 : vector<8x1xf32> to vector<8x8xf32>
    %25 = arith.subf %21, %24 : vector<8x8xf32>
    %26 = math.exp %25 : vector<8x8xf32>
    %cst_13 = arith.constant dense<0.000000e+00> : vector<8xf32>
    %27 = vector.multi_reduction <add>, %26, %cst_13 [1] : vector<8x8xf32> to vector<8xf32>
    %28 = vector.shape_cast %27 : vector<8xf32> to vector<8x1xf32>
    %29 = arith.truncf %26 : vector<8x8xf32> to vector<8x8xbf16>
    %cst_14 = arith.constant dense<0.000000e+00> : vector<8x16xf32>
    %30 = tpu.matmul %29, %16, %cst_14 {dimension_numbers = #tpu.dot_dimension_numbers<[1], [0], [0], [1], [0, 0, 1, 1], [], []>} : vector<8x8xbf16>, vector<8x16xbf16>, vector<8x16xf32> -> vector<8x16xf32>
    %31 = tpu.reciprocal %28 {approx = true} : vector<8x1xf32> -> vector<8x1xf32>
    %32 = vector.broadcast %31 : vector<8x1xf32> to vector<8x16xf32>
    %33 = arith.mulf %30, %32 : vector<8x16xf32>
    %34 = arith.truncf %33 : vector<8x16xf32> to vector<8x16xbf16>
    %35 = arith.index_cast %arg2 : i32 to index
    %c0_15 = arith.constant 0 : index
    %c0_16 = arith.constant 0 : index
    %36 = vector.load %arg9[%35, %c0_15, %c0_16] : memref<4x16x32xbf16, #tpu.memory_space<vmem>>, vector<1x16x32xbf16>
    %37 = vector.shape_cast %36 : vector<1x16x32xbf16> to vector<16x32xbf16>
    %cst_17 = arith.constant dense<0.000000e+00> : vector<8x32xf32>
    %38 = tpu.matmul %34, %37, %cst_17 {dimension_numbers = #tpu.dot_dimension_numbers<[1], [0], [0], [1], [0, 0, 1, 1], [], []>} : vector<8x16xbf16>, vector<16x32xbf16>, vector<8x32xf32> -> vector<8x32xf32>
    %c0_i32_18 = arith.constant 0 : i32
    %39 = arith.cmpi eq, %arg2, %c0_i32_18 : i32
    %40 = arith.extui %39 : i1 to i32
    %c0_i32_19 = arith.constant 0 : i32
    %41 = arith.cmpi ne, %40, %c0_i32_19 : i32
    scf.if %41 {
      %c0_23 = arith.constant 0 : index
      %c0_24 = arith.constant 0 : index
      %48 = vector.load %arg16[%c0_23, %c0_24] : memref<8x32xf32, #tpu.memory_space<vmem>>, vector<8x32xf32>
      tpu.vector_store %arg16[%c0_23, %c0_24], %38 {strides = array<i32>} : memref<8x32xf32, #tpu.memory_space<vmem>>, vector<8x32xf32>,
    } else {
    }
    %c0_i32_20 = arith.constant 0 : i32
    %42 = arith.cmpi sgt, %arg2, %c0_i32_20 : i32
    %43 = arith.extui %42 : i1 to i32
    %c0_i32_21 = arith.constant 0 : i32
    %44 = arith.cmpi ne, %43, %c0_i32_21 : i32
    scf.if %44 {
      %c0_23 = arith.constant 0 : index
      %c0_24 = arith.constant 0 : index
      %48 = vector.load %arg16[%c0_23, %c0_24] : memref<8x32xf32, #tpu.memory_space<vmem>>, vector<8x32xf32>
      %49 = arith.addf %48, %38 : vector<8x32xf32>
      %c0_25 = arith.constant 0 : index
      %c0_26 = arith.constant 0 : index
      %50 = vector.load %arg16[%c0_25, %c0_26] : memref<8x32xf32, #tpu.memory_space<vmem>>, vector<8x32xf32>
      tpu.vector_store %arg16[%c0_25, %c0_26], %49 {strides = array<i32>} : memref<8x32xf32, #tpu.memory_space<vmem>>, vector<8x32xf32>,
    } else {
    }
    %c3_i32 = arith.constant 3 : i32
    %45 = arith.cmpi eq, %arg2, %c3_i32 : i32
    %46 = arith.extui %45 : i1 to i32
    %c0_i32_22 = arith.constant 0 : i32
    %47 = arith.cmpi ne, %46, %c0_i32_22 : i32
    scf.if %47 {
      %c0_23 = arith.constant 0 : index
      %c0_24 = arith.constant 0 : index
      %48 = vector.load %arg16[%c0_23, %c0_24] : memref<8x32xf32, #tpu.memory_space<vmem>>, vector<8x32xf32>
      %c0_25 = arith.constant 0 : index
      %c0_26 = arith.constant 0 : index
      %c0_27 = arith.constant 0 : index
      %49 = vector.load %arg11[%c0_25, %c0_26, %c0_27] : memref<1x8x32xf32, #tpu.memory_space<vmem>>, vector<1x8x32xf32>
      %50 = vector.shape_cast %49 : vector<1x8x32xf32> to vector<8x32xf32>
      %51 = vector.shape_cast %48 : vector<8x32xf32> to vector<1x8x32xf32>
      tpu.vector_store %arg11[%c0_25, %c0_26, %c0_27], %51 {strides = array<i32>} : memref<1x8x32xf32, #tpu.memory_space<vmem>>, vector<1x8x32xf32>,
    } else {
    }
    return
  }
  func.func @transform_0(%arg0: i32, %arg1: i32, %arg2: i32) -> (i32, i32, i32) {
    %c0_i32 = arith.constant 0 : i32
    %c0_i32_0 = arith.constant 0 : i32
    %c0_i32_1 = arith.constant 0 : i32
    return %arg0, %c0_i32, %c0_i32_0 : i32, i32, i32
  }
  func.func @transform_1(%arg0: i32, %arg1: i32, %arg2: i32) -> (i32, i32) {
    %c0_i32 = arith.constant 0 : i32
    %c0_i32_0 = arith.constant 0 : i32
    %c0_i32_1 = arith.constant 0 : i32
    return %c0_i32, %c0_i32_0 : i32, i32
  }
  func.func @transform_2(%arg0: i32, %arg1: i32, %arg2: i32) -> (i32, i32) {
    %c0_i32 = arith.constant 0 : i32
    %c0_i32_0 = arith.constant 0 : i32
    %c0_i32_1 = arith.constant 0 : i32
    return %c0_i32, %c0_i32_0 : i32, i32
  }
  func.func @transform_3(%arg0: i32, %arg1: i32, %arg2: i32) -> (i32, i32) {
    %c0_i32 = arith.constant 0 : i32
    %c0_i32_0 = arith.constant 0 : i32
    %c0_i32_1 = arith.constant 0 : i32
    return %c0_i32, %c0_i32_0 : i32, i32
  }
  func.func @transform_4(%arg0: i32, %arg1: i32, %arg2: i32) -> (i32, i32) {
    %c0_i32 = arith.constant 0 : i32
    %c0_i32_0 = arith.constant 0 : i32
    %c0_i32_1 = arith.constant 0 : i32
    return %c0_i32, %c0_i32_0 : i32, i32
  }
  func.func @transform_5(%arg0: i32, %arg1: i32, %arg2: i32) -> (i32, i32) {
    %c0_i32 = arith.constant 0 : i32
    %c0_i32_0 = arith.constant 0 : i32
    %c0_i32_1 = arith.constant 0 : i32
    return %c0_i32, %c0_i32_0 : i32, i32
  }
  func.func @transform_6(%arg0: i32, %arg1: i32, %arg2: i32) -> (i32, i32, i32) {
    %c0_i32 = arith.constant 0 : i32
    %c0_i32_0 = arith.constant 0 : i32
    %c0_i32_1 = arith.constant 0 : i32
    %c0_i32_2 = arith.constant 0 : i32
    return %c0_i32, %c0_i32_0, %c0_i32_1 : i32, i32, i32
  }
  func.func @transform_7(%arg0: i32, %arg1: i32, %arg2: i32) -> (i32, i32, i32) {
    %c0_i32 = arith.constant 0 : i32
    %c0_i32_0 = arith.constant 0 : i32
    return %arg2, %arg1, %c0_i32 : i32, i32, i32
  }
  func.func @transform_8(%arg0: i32, %arg1: i32, %arg2: i32) -> (i32, i32, i32) {
    %c0_i32 = arith.constant 0 : i32
    %c0_i32_0 = arith.constant 0 : i32
    return %arg0, %arg1, %c0_i32 : i32, i32, i32
  }
}

</mosaic_0001>

<bundles_post_ra>
// kernel: tpu_custom_call.1
= control target key start
LH: loop header
LB: loop body
LE: loop exit
PB: predicated region body
PF: predicated region fallthrough
CT: control target
= control target key end

     0   :  { %s1961_s0 = inlined_call_operand.vmem [shape: f32[2,8,32], index: 0, kind: input, shape index: {}]   ;;  %s1962_s1 = inlined_call_operand.vmem [shape: f32[1,32], index: 1, kind: input, shape index: {}]   ;;  %s1963_s2 = inlined_call_operand.vmem [shape: f32[1,32], index: 2, kind: input, shape index: {}]   ;;  %s1964_s3 = inlined_call_operand.hbm [shape: bf16[32,64], index: 3, kind: input, shape index: {}]   ;;  %s1965_s4 = inlined_call_operand.vmem [shape: bf16[64,32], index: 4, kind: input, shape index: {}]   ;;  %s1966_s5 = inlined_call_operand.hbm [shape: bf16[32,64], index: 5, kind: input, shape index: {}]   ;;  %s1967_s6 = inlined_call_operand.vmem [shape: bf16[4,16,32], index: 6, kind: input, shape index: {}]   ;;  %s1968_s7 = inlined_call_operand.hbm [shape: bf16[4,8,8], index: 7, kind: input, shape index: {}]   ;;  %s1969_s8 = inlined_call_operand.hbm [shape: f32[2,8,32], index: 8, kind: output, shape index: {}]  }
   0x1   :  { %1979 = sst [smem:[#allocation22_spill]] %s1962_s1 }
   0x2   :  { %1980 = sst [smem:[#allocation23_spill]] %s1963_s2 }
   0x3   :  { %1981 = sst [smem:[#allocation24_spill]] %s1964_s3 }
   0x4   :  { %1982 = sst [smem:[#allocation25_spill]] %s1965_s4 }
   0x5   :  { %1983 = sst [smem:[#allocation26_spill]] %s1966_s5 }
   0x6   :  { %1984 = sst [smem:[#allocation27_spill]] %s1967_s6 }
   0x7   :  { %1985 = sst [smem:[#allocation28_spill]] %s1969_s8 }
   0x8   :  { %13 = vsyncpa [#allocation8], 0 }
   0x9   :  { %14 = vsyncpa [#allocation11], 0 }
   0xa   :  { %15 = vsyncpa [#allocation9], 0 }
   0xb   :  { %17 = vsyncpa [#allocation9 + $0x1], 0  ;;  %s1649_s27 = smov 0   ;;  %s1651_s28 = smov 0  }
   0xc   :  { %s1653_s29 = smov 0   ;;  %s1655_s30 = smov 0  }
   0xd   :  { %s1657_s9 = smov 0   ;;  %s1659_s10 = smov 0  }
   0xe   :  { %s1661_s11 = smov 0   ;;  %s1663_s12 = smov 0  }
   0xf   :  { %s1665_s13 = smov 0   ;;  %s1667_s14 = smov 0  }
  0x10   :  { %s1669_s15 = smov 0  }
  0x11 LB: > { %1986 = sst [smem:[#allocation18_spill]] %s1544_s27  ;;  %s1703_s16 = sadd.s32 4294967295, %s1584_s15   ;;  %s1584_s15 = sphi %s1669_s15, %s23_s15   ;;  %s1580_s14 = sphi %s1667_s14, %s2026_s14   ;;  %s1576_s13 = sphi %s1665_s13, %s2025_s13   ;;  %s1572_s12 = sphi %s1663_s12, %s2024_s12   ;;  %s1568_s11 = sphi %s1661_s11, %s2023_s11   ;;  %s1564_s10 = sphi %s1659_s10, %s2022_s10   ;;  %s1560_s9 = sphi %s1657_s9, %s2021_s9   ;;  %s1556_s30 = sphi %s1655_s30, %s2020_s30   ;;  %s1552_s29 = sphi %s1653_s29, %s2019_s29   ;;  %s1548_s28 = sphi %s1651_s28, %s2018_s28   ;;  %s1544_s27 = sphi %s1649_s27, %s2017_s27  }
  0x12   : > { %s1090_s17 = sadd.s32 4294967294, %s1584_s15   ;;  %p216_p0 = scmp.ne.s32.totalorder %s1560_s9, %s1556_s30 }
  0x13   : > { %p1972_p1 = scmp.eq.s32.totalorder %s1703_s16, 0  ;;  %p241_p2 = scmp.ne.s32.totalorder %s1552_s29, %s1548_s28 }
  0x14   : > { %p242_p4 = scmp.eq.s32.totalorder %s1703_s16, 7  ;;  %p247_p5 = scmp.ne.s32.totalorder %s1548_s28, %s1544_s27 }
  0x15   : > { %p1713_p3 = por %p1972_p1, %p216_p0  ;;  %p248_p6 = scmp.eq.s32.totalorder %s1090_s17, 7 }
  0x16   : > { %p1720_p7 = por %p242_p4, %p241_p2  ;;  %p1091_p8 = scmp.ge.s32.totalorder %s1584_s15, 1 }
  0x17   : > { %p1725_p9 = por %p248_p6, %p247_p5  ;;  %p255_p10 = scmp.lt.s32.totalorder %s1584_s15, 9 }
  0x18   : > { %s1988_s20 = scalar_select %p1720_p7, 1, 0 }
  0x19   : > { %s1990_s21 = scalar_select %p1725_p9, 1, 0 }
  0x1a   : > { %1989 = sst [smem:[#allocation19_spill]] %s1988_s20  ;;  %p1730_p11 = pnand %p1091_p8, %p255_p10 }
  0x1b   : > { %1991 = sst [smem:[#allocation20_spill]] %s1990_s21  ;;  %s1586_s23 = smov [#allocation7]  }
  0x1c   : > { %s273_s24 = sshll.u32 %s1586_s23, 4  ;;  %p1235_p12 = pneg %p1730_p11  ;;  %s274_s24 = int_to_ptr.vmem [resolvable:$true] %s273_s24 }
  0x1d   : > { %s1587_s26 = smov [#allocation10]   ;;  %s1387_s17 = scalar_lea.vmem %s274_s24, 256 }
  0x1e   : > { %p1738_p13 = pnand %p1235_p12, %p1972_p1  ;;  %s289_s30 = sshll.u32 %s1587_s26, 4  ;;  %s290_s30 = int_to_ptr.vmem [resolvable:$true] %s289_s30 }
  0x1f   : > { %p1388_p2 = scmp.ne.s32.totalorder %s274_s24, %s1387_s17  ;;  %p1395_p6 = scmp.lt.s32.totalorder %s274_s24, %s274_s24 }
  0x20   : > { %p1378_p0 = pneg %p1738_p13  ;;  %p1396_p8 = scmp.lt.s32.totalorder %s1387_s17, %s1387_s17 }
  0x22   : > { %p1390_p4 = pnand %p1388_p2, %p1378_p0  ;;  %p1397_p10 = por %p1396_p8, %p1395_p6 }
  0x24   : > { %p1391_p5 = pneg %p1390_p4 }
  0x26   : > { %p1398_p12 = pnand %p1397_p10, %p1391_p5 }
  0x28   : > { %1401 = shalt.err (!%p1398_p12)
}
  0x29   : > { %s1588_s23 = smov 64   ;;  %s1589_s18 = smov 4  }
  0x2a   : > { %s1994_s3 = sld [smem:[#allocation24_spill]]  ;;  %s1413_s27 = scalar_lea.vmem %s290_s30, 256 }
  0x2b   : > { %p1414_p1 = scmp.ne.s32.totalorder %s290_s30, %s1413_s27  ;;  %p1421_p9 = scmp.lt.s32.totalorder %s290_s30, %s290_s30 }
  0x2c   : > { %p1422_p7 = scmp.lt.s32.totalorder %s1413_s27, %s1413_s27 }
  0x2d   : > { %p1416_p2 = pnand %p1414_p1, %p1378_p0 }
  0x2e   : > { %p1423_p6 = por %p1422_p7, %p1421_p9 }
  0x2f   : > { %p1417_p4 = pneg %p1416_p2 }
  0x30   : > { %1238 = dma.hbm_to_vmem [thread:$0]  (!%p1738_p13), %s1994_s3, 256, %s274_s24, [#allocation8], %s1588_s23, %s1588_s23, %s1589_s18  }
  0x31   : > { %p1424_p5 = pnand %p1423_p6, %p1417_p4 }
  0x33   : > { %1427 = shalt.err (!%p1424_p5)
}
  0x34   : > { %s1995_s5 = sld [smem:[#allocation26_spill]]  ;;  %s35_s27 = sadd.s32 1, %s1576_s13 }
  0x35   : > { %s42_s21 = sadd.s32 1, %s1580_s14  ;;  %p36_p1 = scmp.ge.s32.totalorder %s35_s27, 4 }
  0x36   : > { %s203_s24 = sadd.s32 1, %s1564_s10  ;;  %p210_p7 = scmp.ne.s32.totalorder %s1564_s10, %s1560_s9 }
  0x37   : > { %p211_p9 = scmp.eq.s32.totalorder %s1584_s15, 0  ;;  %s2028_s27 = smov (%p36_p1, %s35_s27), 0 }
  0x38   : > { %1996 = sst [smem:[#allocation21_spill]] %s2028_s27  ;;  %s2030_s21 = smov (!%p36_p1, %s42_s21), %s1580_s14 }
  0x39   : > { %s198_s8 = ssub.s32 %s1576_s13, %s2028_s27  ;;  %p1771_p0 = por %p211_p9, %p210_p7 }
  0x3a   : > { %1241 = dma.hbm_to_vmem [thread:$0]  (!%p1738_p13), %s1995_s5, 256, %s290_s30, [#allocation11], %s1588_s23, %s1588_s23, %s1589_s18  }
  0x3b   : > { %p44_p13 = scmp.ge.s32.totalorder %s2030_s21, 2  ;;  %p201_p8 = scmp.eq.s32.totalorder %s198_s8, 0 }
  0x3c   : > { %p1252_p10 = scmp.lt.s32.totalorder %s1584_s15, 8  ;;  %s313_s18 = sand.u32 1, %s1584_s15  }
  0x3d   : > { %s2032_s21 = smov (%p44_p13, %s2030_s21), 0  ;;  %s315_s26 = sand.u32 1, %s1564_s10  }
  0x3e   : > { %s1780_s30 = scalar_select %p201_p8, %s1564_s10, %s203_s24  }
  0x3f   : > { %s226_s23 = ssub.s32 %s1580_s14, %s2032_s21  ;;  %s1095_s17 = sshll.u32 %s315_s26, 2 }
  0x40   : > { %p229_p12 = scmp.eq.s32.totalorder %s226_s23, 0  ;;  %s1096_s3 = sshll.u32 %s1576_s13, 6 }
  0x41   : > { %s1998_s5 = sadd.s32 1, %s1552_s29  ;;  %s323_s2 = scalar_lea.hbm %s1968_s7, %s1096_s3 }
  0x42   : > { %s1789_s27 = scalar_select %p229_p12, %s1552_s29, %s1998_s5  }
  0x43   : > { %s317_s8 = scalar_lea.vmem [#allocation12], %s1095_s17  ;;  %p1798_p2 = pnand %p1252_p10, %p1771_p0 }
  0x44   : > { %s325_s1 = sshll.u32 %s317_s8, 4  ;;  %s314_s24 = scalar_lea.sflag [#allocation8], %s313_s18  ;;  %s326_s1 = int_to_ptr.vmem [resolvable:$true] %s325_s1 }
  0x45   : > { %p1430_p4 = pneg %p1798_p2  ;;  %s1441_s23 = scalar_lea.vmem %s326_s1, 64 }
  0x46   : > { %p1442_p6 = scmp.ne.s32.totalorder %s326_s1, %s1441_s23  ;;  %s1590_s5 = smov [#allocation12]  }
  0x47   : > { %s1446_s6 = sshll.u32 %s1590_s5, 4  ;;  %s1447_s6 = int_to_ptr.vmem [resolvable:$false] %s1446_s6 }
  0x48   : > { %p1444_p5 = pnand %p1442_p6, %p1430_p4  ;;  %s1448_s3 = scalar_lea.vmem %s1447_s6, 128 }
  0x49   : > { %p1449_p7 = scmp.lt.s32.totalorder %s326_s1, %s1447_s6  ;;  %p1450_p9 = scmp.lt.s32.totalorder %s1448_s3, %s1441_s23 }
  0x4a   : > { %p1445_p1 = pneg %p1444_p5 }
  0x4b   : > { %p1451_p13 = por %p1450_p9, %p1449_p7 }
  0x4d   : > { %p1452_p0 = pnand %p1451_p13, %p1445_p1 }
  0x4f   : > { %1455 = shalt.err (!%p1452_p0)
}
  0x50   : > { %1245 = dma.hbm_to_vmem [thread:$0]  (!%p1798_p2), %s323_s2, 64, %s326_s1, %s314_s24  }
  0x51   : > { %334 = sbr.rel (%p1730_p11) target bundleno = 1862 (0x746), region = 52  ;;  %p2000_p8 = scmp.eq.s32.totalorder (!%p1730_p11), %s1703_s16, 0 }
  0x56   : > { %1527 = dma.done.wait (%p2000_p8), [#allocation8], 256   ;;  %p2001_p10 = pmov %p2000_p8 }
  0x57   : > { %p2002_p12 = pmov %p2000_p8 }
  0x58   : > { %1529 = vsyncadd (%p2001_p10), [#allocation8], 4294967040 }
  0x59   : > { %1531 = dma.done.wait (%p2002_p12), [#allocation11], 256   ;;  %p2003_p4 = pmov %p2000_p8 }
  0x5a   : > { %s344_s4 = sand.u32 1, %s1703_s16   ;;  %s346_s1 = sand.u32 1, %s1560_s9  }
  0x5b   : > { %1533 = vsyncadd (%p2003_p4), [#allocation11], 4294967040  ;;  %s1818_s2 = sshll.u32 %s346_s1, 2  ;;  %s345_s20 = scalar_lea.sflag [#allocation8], %s344_s4 }
  0x5c   : > { %s348_s22 = scalar_lea.vmem [#allocation12], %s1818_s2 }
  0x5d   : > { %1535 = dma.done.wait (%p1713_p3), %s345_s20, 64  }
  0x5e   : > { %1537 = vsyncadd (%p1713_p3), %s345_s20, 4294967232  ;;  %s382_s25 = sand.u32 1, %s1548_s28   ;;  %p385_p11 = scmp.lt.s32.totalorder %s1572_s12, 1 }
  0x5f   : > { %s1829_s16 = sshll.u32 %s382_s25, 3  ;;  %p391_p2 = scmp.eq.s32.totalorder %s1568_s11, 0 }
  0x60   : > { %s386_s18 = scalar_select %p385_p11, %s1572_s12, 1  ;;  %vm397_vm0 = vcmask (%p391_p2), 261120   ;;  %v1360_v7 = vld [vmem:[#allocation10 + $0x8] sm:$0xff] (%p391_p2)   ;;  %v1591_v8 = vmov (%p391_p2), 0.0   ;;  %vm1592_vm1 = vmmov (%p391_p2), 0   ;;  %v1361_v9 = vld [vmem:[#allocation10] sm:$0xff] (%p391_p2)  }
  0x61   : > { %s384_s19 = scalar_lea.vmem [#allocation13], %s1829_s16  ;;  %395 = sbr.rel (!%p391_p2) target bundleno = 726 (0x2d6), region = 68  ;;  %1188 = vmatprep.subr.bf16.mxu1 (%p391_p2), %v1591_v8  ;;  %1192 = vmatprep.mubr.msk.bf16.mxu1 (%p391_p2), %vm1592_vm1, %v1591_v8  ;;  %vm429_vm2 = vcmask (%p391_p2), 257024   ;;  %vm610_vm3 = vcmask (%p391_p2), 125952   ;;  %vm607_vm4 = vcmask (%p391_p2), 60416  }
  0x62   : > { %s1102_s26 = sshll.u32 %s386_s18, 3  ;;  %1189 = vmatpush3.bf16.msra.mxu1 (%p391_p2), %v1360_v7  ;;  %s2004_s6 = sld [smem:[#allocation25_spill]] (%p391_p2) }
  0x63   : > { %s388_s24 = scalar_lea.vmem %s1961_s0, %s1102_s26  ;;  %1190 = vmatprep.subr.bf16.mxu1 (%p391_p2), %v1591_v8  ;;  %s2005_s1 = sld [smem:[#allocation22_spill]] (%p391_p2) }
  0x64   : > { %v396_v0 = vld [vmem:[%s388_s24] sm:$0xff] (%p391_p2)  ;;  %s2006_s26 = sld [smem:[#allocation23_spill]] (%p391_p2)  ;;  %s1593_s4 = smov (%p391_p2), 80  }
  0x65   : > { %v398_v1 = vsel (%p391_p2), %vm397_vm0, %v396_v0, 0.0  ;;  %s1595_s20 = smov (%p391_p2), 96  }
  0x66   : > { %399 = vadd.xlane.f32.xlu0 %v398_v1  ;;  %1191 = vmatpush3.bf16.msra.mxu1 %v1361_v9 }
  0x68   : > { %v1362_v10 = vld [vmem:[%s2004_s6] sm:$0xff]   ;;  %v1363_v22 = vld [vmem:[%s2004_s6 + $0x8] sm:$0xff]   ;;  %v1364_v23 = vld [vmem:[%s2004_s6 + $0x10] sm:$0xff]  }
  0x69   : > { %1180 = vmatprep.mubr.msk.bf16.mxu0 %vm397_vm0, %v1362_v10  ;;  %v1104_v15 = vld [vmem:[%s2005_s1] ss:$0 sm:$0xff]  ;;  %v1365_v24 = vld [vmem:[%s2004_s6 + $0x18] sm:$0xff]   ;;  %s1594_s1 = smov 112  }
  0x6a   : > { %v1105_v17 = vld [vmem:[%s2006_s26] ss:$0 sm:$0xff] }
  0xef   : > { %v400_v2 = vpop.xlane.xlu0 %399 }
  0xf0   : > { %v402_v3 = vmul.f32 0.03125, %v400_v2 }
  0xf2   : > { %v403_v4 = vsub.f32 %v396_v0, %v402_v3 }
  0xf4   : > { %v404_v5 = vmul.f32 %v403_v4, %v403_v4 }
  0xf6   : > { %v405_v6 = vsel %vm397_vm0, %v404_v5, 0.0 }
  0xf7   : > { %406 = vadd.xlane.f32.xlu0 %v405_v6 }
 0x180   : > { %v407_v11 = vpop.xlane.xlu0 %406 }
 0x181   : > { %v408_v12 = vmul.f32 0.03125, %v407_v11 }
 0x183   : > { %v409_v13 = vadd.f32 1e-05, %v408_v12 }
 0x185   : > { %1366 = vrsqrt.f32 %v409_v13 }
 0x192   : > { %v1367_v14 = vpop.eup %1366 }
 0x193   : > { %v411_v16 = vmul.f32 %v1367_v14, %v403_v4 }
 0x195   : > { %v419_v18 = vmul.f32 %v1104_v15, %v411_v16 }
 0x197   : > { %v427_v19 = vadd.f32 %v1105_v17, %v419_v18 }
 0x199   : > { %v428_v20 = vpack.c.bf16 %v427_v19, %v427_v19 }
 0x19b   : > { %430 = vst.msk [vmem:[#allocation2] sm:$0xf] %vm429_vm2, %v428_v20  ;;  %1222 = vmatprep.subr.msk.bf16.mxu0 %vm397_vm0, %v428_v20  ;;  %1193 = vmatmul.mubr.msk.bf16.vlgmr.msra.gmra.mxu1 %vm397_vm0, %v428_v20  ;;  %v472_v21 = vsel %vm397_vm0, %v428_v20, 0 }
 0x19c   : > { %1179 = vmatpush3.bf16.xpose.msra.mxu0 %v472_v21 }
 0x1a3   : > { %1181 = vmatmul.mubr.msk.bf16.vlgmr.msra.gmra.mxu0 %vm397_vm0, %v1363_v22 }
 0x1a4   : > { %1184 = vmatprep.mubr.msk.bf16.mxu0 %vm397_vm0, %v1364_v23 }
 0x1ab   : > { %1185 = vmatmul.mubr.msk.bf16.gmra.mxu0 %vm397_vm0, %v1365_v24 }
 0x25b   : > { %v593_v25 = vpop.f32.mrf.mxu1 }
 0x25c   : > { %v599_v26 = vpack.c.bf16 %v593_v25, %v593_v25 }
 0x25d   : > { %v1194_v27 = vpop.f32.mrf.mxu1 }
 0x25e   : > { %655 = vrot.lane.b32.xlu0 %v599_v26, %s1593_s4  ;;  %625 = vrot.lane.b32.xlu1 %v599_v26, %s1594_s1  ;;  %611 = vst.msk [vmem:[#allocation4] sm:$0xf] %vm610_vm3, %v599_v26 }
 0x25f   : > { %v596_v28 = vpop.f32.mrf.mxu1 }
 0x261   : > { %v1195_v29 = vpop.f32.mrf.mxu1 }
 0x262   : > { %640 = vrot.lane.b32.xlu1 %v599_v26, %s1595_s20 }
 0x263   : > { %v1182_v30 = vpop.f32.mrf.mxu0 }
 0x264   : > { %v1151_v31 = vpack.c.bf16 %v1182_v30, %v1182_v30 }
 0x265   : > { %v508_v32 = vpop.f32.mrf.mxu0 }
 0x266   : > { %620 = vst.msk [vmem:[#allocation3 + $0x8] sm:$0xf] %vm607_vm4, %v1151_v31  ;;  %v1149_v33 = vpack.c.bf16 %v508_v32, %v508_v32 }
 0x267   : > { %v1183_v34 = vpop.f32.mrf.mxu0 }
 0x268   : > { %608 = vst.msk [vmem:[#allocation3] sm:$0xf] %vm607_vm4, %v1149_v33  ;;  %v1152_v35 = vpack.c.bf16 %v1183_v34, %v1183_v34 }
 0x269   : > { %v511_v36 = vpop.f32.mrf.mxu0 }
 0x26a   : > { %621 = vst.msk [vmem:[#allocation3 + $0xc] sm:$0xf] %vm607_vm4, %v1152_v35  ;;  %v1150_v37 = vpack.c.bf16 %v511_v36, %v511_v36 }
 0x26b   : > { %v1186_v38 = vpop.f32.mrf.mxu0 }
 0x26c   : > { %609 = vst.msk [vmem:[#allocation3 + $0x4] sm:$0xf] %vm607_vm4, %v1150_v37  ;;  %v1156_v39 = vpack.c.bf16 %v1186_v38, %v1186_v38 }
 0x26d   : > { %v524_v40 = vpop.f32.mrf.mxu0 }
 0x26e   : > { %653 = vst.msk [vmem:[#allocation3 + $0x18] sm:$0xf] %vm607_vm4, %v1156_v39  ;;  %v1154_v41 = vpack.c.bf16 %v524_v40, %v524_v40 }
 0x26f   : > { %v1187_v42 = vpop.f32.mrf.mxu0 }
 0x270   : > { %638 = vst.msk [vmem:[#allocation3 + $0x10] sm:$0xf] %vm607_vm4, %v1154_v41  ;;  %v1157_v43 = vpack.c.bf16 %v1187_v42, %v1187_v42 }
 0x271   : > { %v527_v44 = vpop.f32.mrf.mxu0 }
 0x272   : > { %654 = vst.msk [vmem:[#allocation3 + $0x1c] sm:$0xf] %vm607_vm4, %v1157_v43  ;;  %v1155_v45 = vpack.c.bf16 %v527_v44, %v527_v44 }
 0x274   : > { %639 = vst.msk [vmem:[#allocation3 + $0x14] sm:$0xf] %vm607_vm4, %v1155_v45 }
 0x2d0   : > { %v656_v46 = vpop.permute.xlu0 %655  ;;  %v626_v47 = vpop.permute.xlu1 %625 }
 0x2d1   : > { %659 = vst.msk [vmem:[#allocation4 + $0xc] sm:$0xf] %vm610_vm3, %v656_v46  ;;  %629 = vst.msk [vmem:[#allocation4 + $0x4] sm:$0xf] %vm610_vm3, %v626_v47 }
 0x2d4   : > { %v641_v48 = vpop.permute.xlu1 %640 }
 0x2d5   : > { %644 = vst.msk [vmem:[#allocation4 + $0x8] sm:$0xf] %vm610_vm3, %v641_v48 }
 0x2d6 PF: > { %p1126_p3 = scmp.ne.s32.totalorder %s1568_s11, 0 }
 0x2d7   : > { %s1598_s18 = smov (!%p1126_p3), 80   ;;  %s1599_s26 = smov (!%p1126_p3), 112  }
 0x2d8   : > { %662 = sbr.rel (%p1126_p3) target bundleno = 1057 (0x421), region = 72  ;;  %s1600_s17 = smov (!%p1126_p3), 96  }
 0x2dd   : > { %v1368_v49 = vld [vmem:[#allocation7 + $0x8] sm:$0xff]   ;;  %v1596_v50 = vmov 0.0   ;;  %v1369_v51 = vld [vmem:[#allocation7] sm:$0xff]   ;;  %vm1597_vm5 = vmmov 0   ;;  %v668_v52 = vld [vmem:[#allocation2] sm:$0xf] }
 0x2de   : > { %1196 = vmatprep.subr.bf16.mxu0 %v1596_v50  ;;  %1200 = vmatprep.mubr.msk.bf16.mxu0 %vm1597_vm5, %v1596_v50  ;;  %vm685_vm6 = vcmask 261120   ;;  %vm730_vm7 = vcmask 125952  }
 0x2df   : > { %1197 = vmatpush3.bf16.msra.mxu0 %v1368_v49 }
 0x2e0   : > { %1198 = vmatprep.subr.bf16.mxu0 %v1596_v50 }
 0x2e3   : > { %1199 = vmatpush3.bf16.msra.mxu0 %v1369_v51 }
 0x2e6   : > { %1201 = vmatmul.mubr.msk.bf16.vlgmr.msra.gmra.mxu0 %vm685_vm6, %v668_v52 }
 0x3a6   : > { %v723_v53 = vpop.f32.mrf.mxu0 }
 0x3a7   : > { %v729_v54 = vpack.c.bf16 %v723_v53, %v723_v53 }
 0x3a8   : > { %v1202_v55 = vpop.f32.mrf.mxu0 }
 0x3a9   : > { %745 = vrot.lane.b32.xlu1 %v729_v54, %s1598_s18  ;;  %735 = vrot.lane.b32.xlu0 %v729_v54, %s1599_s26  ;;  %731 = vst.msk [vmem:[#allocation5] sm:$0xf] %vm730_vm7, %v729_v54 }
 0x3aa   : > { %v726_v56 = vpop.f32.mrf.mxu0 }
 0x3ac   : > { %v1203_v57 = vpop.f32.mrf.mxu0 }
 0x3ad   : > { %740 = vrot.lane.b32.xlu0 %v729_v54, %s1600_s17 }
 0x41b   : > { %v746_v58 = vpop.permute.xlu1 %745  ;;  %v736_v59 = vpop.permute.xlu0 %735 }
 0x41c   : > { %749 = vst.msk [vmem:[#allocation5 + $0xc] sm:$0xf] %vm730_vm7, %v746_v58  ;;  %739 = vst.msk [vmem:[#allocation5 + $0x4] sm:$0xf] %vm730_vm7, %v736_v59 }
 0x41f   : > { %v741_v60 = vpop.permute.xlu0 %740 }
 0x420   : > { %744 = vst.msk [vmem:[#allocation5 + $0x8] sm:$0xf] %vm730_vm7, %v741_v60 }
 0x421 PF: > { %s1159_s8 = sshll.u32 %s1568_s11, 3  ;;  %s1131_s24 = sshll.u32 %s1568_s11, 2  ;;  %v1601_v61 = vmov 0.0   ;;  %vm1602_vm8 = vmmov 0   ;;  %vm769_vm9 = vcmask 130048   ;;  %vm813_vm10 = vcmask 64512  }
 0x422   : > { %1204 = vmatprep.subr.bf16.mxu0 %v1601_v61  ;;  %1206 = vmatprep.mubr.msk.bf16.mxu0 %vm1602_vm8, %v1601_v61  ;;  %s755_s23 = scalar_lea.vmem [#allocation3], %s1159_s8  ;;  %s2007_s4 = sld [smem:[#allocation27_spill]]  ;;  %v761_v0 = vld [vmem:[%s348_s22] sm:$0xf]  ;;  %vm827_vm11 = vcmask 1043456  }
 0x423   : > { %v1370_v62 = vld [vmem:[%s755_s23] sm:$0xff]   ;;  %1210 = vmatprep.subr.bf16.mxu1 %v1601_v61  ;;  %1212 = vmatprep.mubr.msk.bf16.mxu1 %vm1602_vm8, %v1601_v61  ;;  %s751_s20 = scalar_lea.vmem [#allocation5], %s1131_s24  ;;  %v762_v1 = vunpack.c.l.bf16 %v761_v0  ;;  %s759_s18 = scalar_lea.vmem [#allocation4], %s1131_s24 }
 0x424   : > { %1205 = vmatpush3.bf16.msra.mxu0 %v1370_v62  ;;  %v760_v8 = vld [vmem:[%s759_s18] sm:$0xf] }
 0x425   : > { %1216 = vmatprep.subr.bf16.mxu0 %v1601_v61  ;;  %v829_v9 = vsel %vm827_vm11, %v760_v8, 0 }
 0x426   : > { %1211 = vmatpush3.bf16.msra.mxu1 %v829_v9 }
 0x427   : > { %v752_v63 = vld [vmem:[%s751_s20] sm:$0xf] }
 0x428   : > { %s1888_s1 = scalar_lea.vmem %s2007_s4, %s1159_s8  ;;  %1207 = vmatmul.mubr.msk.bf16.vlgmr.msra.gmra.mxu0 %vm769_vm9, %v752_v63 }
 0x429   : > { %1218 = vmatprep.mubr.msk.bf16.mxu0 %vm1602_vm8, %v1601_v61  ;;  %v1371_v16 = vld [vmem:[%s1888_s1] sm:$0xff]  }
 0x42a   : > { %1217 = vmatpush3.bf16.msra.mxu0 %v1371_v16 }
 0x4e8   : > { %v807_v2 = vpop.f32.mrf.mxu0 }
 0x4e9   : > { %v808_v3 = vadd.f32 %v807_v2, %v762_v1 }
 0x4ea   : > { %v1208_v4 = vpop.f32.mrf.mxu0 }
 0x4eb   : > { %v814_v5 = vsel %vm813_vm10, %v808_v3, -inf }
 0x4ec   : > { %815 = vmax.xlane.f32.xlu0 %v814_v5  ;;  %v810_v6 = vpop.f32.mrf.mxu0 }
 0x4ee   : > { %v1209_v7 = vpop.f32.mrf.mxu0 }
 0x575   : > { %v816_v10 = vpop.xlane.xlu0 %815 }
 0x576   : > { %v817_v11 = vsub.f32 %v808_v3, %v816_v10 }
 0x578   : > { %v818_v12 = vmul.f32 1.442695, %v817_v11 }
 0x57a   : > { %1372 = vpow2.f32 %v818_v12 }
 0x587   : > { %v1373_v13 = vpop.eup %1372 }
 0x588   : > { %v820_v14 = vsel %vm813_vm10, %v1373_v13, 0.0  ;;  %v823_v15 = vpack.c.bf16 %v1373_v13, %v1373_v13 }
 0x589   : > { %821 = vadd.xlane.f32.xlu0 %v820_v14 }
 0x58a   : > { %1213 = vmatmul.mubr.msk.bf16.vlgmr.msra.gmra.mxu1 %vm813_vm10, %v823_v15 }
 0x612   : > { %v822_v17 = vpop.xlane.xlu0 %821 }
 0x613   : > { %1374 = vrcp.f32 %v822_v17 }
 0x620   : > { %v1375_v18 = vpop.eup %1374 }
 0x64a   : > { %v865_v19 = vpop.f32.mrf.mxu1 }
 0x64b   : > { %v872_v20 = vmul.f32 %v1375_v18, %v865_v19 }
 0x64c   : > { %v1214_v21 = vpop.f32.mrf.mxu1 }
 0x64d   : > { %v873_v22 = vpack.c.bf16 %v872_v20, %v872_v20 }
 0x64e   : > { %v868_v23 = vpop.f32.mrf.mxu1 }
 0x64f   : > { %1219 = vmatmul.mubr.msk.bf16.vlgmr.msra.gmra.mxu0 %vm769_vm9, %v873_v22 }
 0x650   : > { %v1215_v24 = vpop.f32.mrf.mxu1 }
 0x70f   : > { %v921_v25 = vpop.f32.mrf.mxu0 }
 0x711   : > { %v1220_v26 = vpop.f32.mrf.mxu0  ;;  %929 = sbr.rel (%p1126_p3) target bundleno = 1816 (0x718), region = 76 }
 0x713   : > { %v924_v27 = vpop.f32.mrf.mxu0 }
 0x715   : > { %v1221_v28 = vpop.f32.mrf.mxu0 }
 0x716   : > { %vm930_vm12 = vcmask 261120  }
 0x717   : > { %931 = vst.msk [vmem:[#allocation6] sm:$0xff] %vm930_vm12, %v921_v25 }
 0x718 PF: > { %p1142_p6 = scmp.le.s32.totalorder %s1568_s11, 0 }
 0x71a   : > { %935 = sbr.rel (%p1142_p6) target bundleno = 1827 (0x723), region = 80 }
 0x71f   : > { %v936_v29 = vld [vmem:[#allocation6] sm:$0xff]  ;;  %vm938_vm13 = vcmask 261120  }
 0x720   : > { %v937_v30 = vadd.f32 %v936_v29, %v921_v25 }
 0x722   : > { %939 = vst.msk [vmem:[#allocation6] sm:$0xff] %vm938_vm13, %v937_v30 }
 0x723 PF: > { %p1143_p5 = scmp.ne.s32.totalorder %s1568_s11, 3 }
 0x725   : > { %943 = sbr.rel (%p1143_p5) target bundleno = 1836 (0x72c), region = 84 }
 0x72a   : > { %v944_v31 = vld [vmem:[#allocation6] sm:$0xff]  ;;  %vm945_vm14 = vcmask 261120  }
 0x72b   : > { %946 = vst.msk [vmem:[%s384_s19] sm:$0xff] %vm945_vm14, %v944_v31 }
 0x72c PF: > { %s2008_s2 = sld [smem:[#allocation19_spill]]  ;;  %s1145_s22 = sshll.u32 %s1572_s12, 7 }
 0x72d   : > { %s2009_s8 = sld [smem:[#allocation28_spill]]  ;;  %s962_s23 = sshll.u32 %s384_s19, 4  ;;  %s963_s23 = int_to_ptr.vmem [resolvable:$true] %s962_s23 }
 0x72e   : > { %s948_s11 = scalar_lea.sflag [#allocation9], %s382_s25  ;;  %s1456_s5 = scalar_lea.vmem %s963_s23, 128 }
 0x72f   : > { %p1457_p1 = scmp.ne.s32.totalorder %s963_s23, %s1456_s5  ;;  %s1603_s3 = smov [#allocation13]  }
 0x730   : > { %s1460_s4 = sshll.u32 %s1603_s3, 4  ;;  %s1461_s4 = int_to_ptr.vmem [resolvable:$false] %s1460_s4 }
 0x731   : > { %s1462_s1 = scalar_lea.vmem %s1461_s4, 256  ;;  %p1463_p0 = scmp.lt.s32.totalorder %s963_s23, %s1461_s4 }
 0x732   : > { %p2010_p7 = scmp.ne.s32.totalorder %s2008_s2, 0  ;;  %p1464_p8 = scmp.lt.s32.totalorder %s1462_s1, %s1456_s5 }
 0x733   : > { %s960_s24 = scalar_lea.hbm %s2009_s8, %s1145_s22 }
 0x734   : > { %p1458_p9 = pnand %p1457_p1, %p2010_p7  ;;  %p1465_p10 = por %p1464_p8, %p1463_p0 }
 0x736   : > { %p1459_p13 = pneg %p1458_p9 }
 0x738   : > { %p1466_p12 = pnand %p1465_p10, %p1459_p13 }
 0x73a   : > { %1469 = shalt.err (!%p1466_p12)
}
 0x73b   : > { %s1470_s12 = scalar_lea.hbm %s960_s24, 128  ;;  %s1474_s19 = scalar_lea.hbm %s2009_s8, 256 }
 0x73c   : > { %p1471_p4 = scmp.ne.s32.totalorder %s960_s24, %s1470_s12  ;;  %p1475_p3 = scmp.lt.s32.totalorder %s960_s24, %s2009_s8 }
 0x73d   : > { %p1476_p6 = scmp.lt.s32.totalorder %s1474_s19, %s1470_s12 }
 0x73e   : > { %p1472_p11 = pnand %p1471_p4, %p2010_p7 }
 0x73f   : > { %p1477_p5 = por %p1476_p6, %p1475_p3 }
 0x740   : > { %p1473_p2 = pneg %p1472_p11 }
 0x742   : > { %p1478_p1 = pnand %p1477_p5, %p1473_p2 }
 0x744   : > { %1481 = shalt.err (!%p1478_p1)
}
 0x745   : > { %1233 = dma.vmem_to_hbm [thread:$0]  (%p2010_p7), %s963_s23, 128, %s960_s24, %s948_s11  }
 0x746 PF: > { %s2011_s22 = sld [smem:[#allocation18_spill]]  ;;  %p1255_p9 = scmp.ge.s32.totalorder %s1584_s15, 2 }
 0x747   : > { %s2012_s26 = sld [smem:[#allocation20_spill]] }
 0x74c   : > { %s974_s17 = sand.u32 1, %s2011_s22  }
 0x74d   : > { %p2013_p13 = scmp.ne.s32.totalorder %s2012_s26, 0  ;;  %s975_s5 = scalar_lea.sflag [#allocation9], %s974_s17 }
 0x74f   : > { %p1247_p0 = pnand %p1255_p9, %p2013_p13 }
 0x751   : > { %p1248_p8 = pneg %p1247_p0 }
 0x753   : > { %1539 = dma.done.wait (%p1248_p8), %s975_s5, 128  }
 0x754   : > { %1541 = vsyncadd (%p1248_p8), %s975_s5, 4294967168  ;;  %s23_s15 = sadd.s32 1, %s1584_s15   ;;  %s2014_s3 = smov %s1789_s27 }
 0x755   : > { %p20_p10 = scmp.ge.s32.totalorder %s23_s15, 10   ;;  %s2015_s2 = smov %s1780_s30 }
 0x756   : > { %s2016_s24 = sld [smem:[#allocation21_spill]]  ;;  %s2017_s27 = smov %s1548_s28 }
 0x757   : > { %s2018_s28 = smov %s1552_s29  ;;  %s2019_s29 = smov %s2014_s3 }
 0x758   : > { %s2020_s30 = smov %s1560_s9  ;;  %s2021_s9 = smov %s1564_s10 }
 0x759   : > { %s2022_s10 = smov %s2015_s2  ;;  %s2023_s11 = smov %s1576_s13 }
 0x75a   : > { %s2024_s12 = smov %s1580_s14  ;;  %s2026_s14 = smov %s2032_s21 }
 0x75b   :  { %22 = sbr.rel (!%p20_p10) target bundleno = 17 (0x11), region = 141 }
 0x75c   : > { %s2025_s13 = smov %s2016_s24 }
 0x760   :  { %980 = vsyncpa [#allocation8], 1 }
 0x761   :  { %982 = vsyncpa [#allocation8 + $0x1], 1 }
 0x762   :  { %983 = vsyncpa [#allocation11], 1 }
 0x763   :  { %984 = vsyncpa [#allocation9], 1 }
 0x764   :  { %986 = vsyncpa [#allocation9 + $0x1], 1 }

</bundles_post_ra>
